<compile_context>
chip_gen: v7x
topology: tpu7x:2x2x1
jax: 0.10.0
libtpu: 0.0.40
codegen_flags: <defaults>
</compile_context>

<pallas_src>
import jax
import jax.numpy as jnp
from jax.experimental import pallas as pl
from jax.experimental.pallas import tpu as pltpu


# ------------------------- fused forward-pass kernel -------------------------
def fused_clf_kernel(xc_ref, bp0_ref, w0_ref, b0_ref,
                     bp1_ref, w1_ref, b1_ref,
                     bp2_ref, w2_ref, b2_ref,
                     wfc_ref, msk_ref, t_ref, s_ref, bfc_ref,
                     o_ref):
    f32 = jnp.float32

    # --- FGL layer 0 (C_in = 1): VPU channel broadcast, then mean-pool matmul ---
    g0 = xc_ref[...] * w0_ref[...]                                              # (N*V0, C1)
    h0 = jnp.dot(bp0_ref[...], g0, preferred_element_type=f32) + b0_ref[...]    # (N*V1, C1)

    # --- FGL layer 1: block-diagonal mean-pool matmul + channel-mix matmul ---
    a1 = jnp.dot(bp1_ref[...], h0, preferred_element_type=f32)                  # (N*V2, C1)
    h1 = jnp.dot(a1, w1_ref[...], preferred_element_type=f32) + b1_ref[...]     # (N*V2, C2)

    # --- FGL layer 2 ---
    a2 = jnp.dot(bp2_ref[...], h1, preferred_element_type=f32)                  # (N*V3, C2)
    h2 = jnp.dot(a2, w2_ref[...], preferred_element_type=f32) + b2_ref[...]     # (N*V3, C3)

    # --- FC head: out[n,k] = sum_{c,v} h2[n*V3+v, c] * wfc[c*V3+v, k] + bfc[k] ---
    z = jnp.dot(h2, wfc_ref[...], preferred_element_type=f32) * msk_ref[...]    # (N*V3, V3*K)
    zs = jnp.dot(z, s_ref[...], preferred_element_type=f32)                     # (N*V3, K)
    o_ref[...] = jnp.dot(t_ref[...], zs, preferred_element_type=f32) + bfc_ref[...]  # (N, K)


# ------------------------------ host-side wrapper -----------------------------
def smaller_classifier_forward(x, fgl_params, fc_params):
    N, v0 = x.shape
    (pool0, w0, b0), (pool1, w1, b1), (pool2, w2, b2) = fgl_params
    wfc, bfc = fc_params
    c1, c2, c3 = w0.shape[1], w1.shape[1], w2.shape[1]
    v1, v2, v3 = pool0.shape[1], pool1.shape[1], pool2.shape[1]
    K = wfc.shape[1]
    f32 = jnp.float32

    # Batch-folded block-diagonal pooling matrices (host prep, free).
    eye_n = jnp.eye(N, dtype=f32)
    bp0 = jnp.kron(eye_n, pool0.T)                      # (N*v1, N*v0)
    bp1 = jnp.kron(eye_n, pool1.T)                      # (N*v2, N*v1)
    bp2 = jnp.kron(eye_n, pool2.T)                      # (N*v3, N*v2)

    # Channels-last folded input column and 2-D biases / layer-0 weight row.
    xc = x.reshape(N * v0, 1).astype(f32)               # (N*v0, 1)
    w0r = w0.reshape(1, c1)
    b0r, b1r, b2r = b0.reshape(1, c1), b1.reshape(1, c2), b2.reshape(1, c3)

    # FC head prep: wfc[(c*V3 + v), k] -> Wstack[c, v*K + k]; 0/1 selection matrices.
    wstack = wfc.reshape(c3, v3 * K)                    # (C3, V3*K)
    row_v = jnp.arange(N * v3) % v3
    col_v = jnp.arange(v3 * K) // K
    msk = (row_v[:, None] == col_v[None, :]).astype(f32)            # (N*v3, v3*K)
    tmat = (jnp.arange(N * v3)[None, :] // v3
            == jnp.arange(N)[:, None]).astype(f32)                  # (N, N*v3)
    smat = (jnp.arange(v3 * K)[:, None] % K
            == jnp.arange(K)[None, :]).astype(f32)                  # (v3*K, K)
    bfcr = bfc.reshape(1, K)

    ins = [xc, bp0, w0r, b0r, bp1, w1, b1r, bp2, w2, b2r,
           wstack, msk, tmat, smat, bfcr]
    in_specs = [pl.BlockSpec(a.shape, lambda i: (0, 0)) for a in ins]

    return pl.pallas_call(
        fused_clf_kernel,
        out_shape=jax.ShapeDtypeStruct((N, K), f32),
        grid=(1,),
        in_specs=in_specs,
        out_specs=pl.BlockSpec((N, K), lambda i: (0, 0)),
        compiler_params=pltpu.CompilerParams(dimension_semantics=("arbitrary",)),
    )(*ins)


# ------------------------------ parameter setup ------------------------------
def weight_normed(v, g):
    # PyTorch weight_norm over the per-output-unit fan-in: w = g * v / ||v||.
    # Here v is (fan_in, fan_out), g is (fan_out,).
    return g * v / jnp.linalg.norm(v, axis=0, keepdims=True)


if __name__ == "__main__":
    key = jax.random.PRNGKey(0)
    N = 2
    # Small stand-ins for node_sizes=[in_features,1024,256,32], channel_sizes=[1,32,64,128]
    node_sizes = [256, 64, 16, 8]
    channel_sizes = [1, 32, 64, 128]
    num_classes = 5                          # len(meta['c2i'])

    keys = jax.random.split(key, 9)
    x = jax.random.normal(keys[0], (N, node_sizes[0]), jnp.float32)

    fgl_params = []
    for i in range(3):
        c_in, c_out = channel_sizes[i], channel_sizes[i + 1]
        v_in, v_out = node_sizes[i], node_sizes[i + 1]
        v_w = jax.random.normal(keys[1 + 2 * i], (c_in, c_out), jnp.float32) * 0.1
        g_w = 1.0 + 0.1 * jax.random.normal(keys[2 + 2 * i], (c_out,), jnp.float32)
        w = weight_normed(v_w, g_w)
        b = jnp.zeros((c_out,), jnp.float32)
        k = v_in // v_out
        pool = jnp.repeat(jnp.eye(v_out, dtype=jnp.float32), k, axis=0) / k  # (V_in, V_out)
        fgl_params.append((pool, w, b))

    feat = node_sizes[-1] * channel_sizes[-1]
    v_fc = jax.random.normal(keys[7], (feat, num_classes), jnp.float32) * 0.05
    g_fc = 1.0 + 0.1 * jax.random.normal(keys[8], (num_classes,), jnp.float32)
    w_fc = weight_normed(v_fc, g_fc)
    b_fc = jnp.zeros((num_classes,), jnp.float32)

    out = smaller_classifier_forward(x, fgl_params, (w_fc, b_fc))
    out = jax.block_until_ready(out)

    # Pure-JAX reference for correctness.
    ref = x[:, None, :]
    for pool, w, b in fgl_params:
        agg = jnp.einsum("ncv,vo->nco", ref, pool)
        ref = jnp.einsum("ncv,cd->ndv", agg, w) + b[None, :, None]
    ref = ref.reshape(N, -1) @ w_fc + b_fc
    assert out.shape == (N, num_classes)
    assert jnp.allclose(out, ref, atol=1e-4, rtol=1e-4)

    print("KERNEL_OK")
</pallas_src>

<mosaic_0001>
module attributes {stable_mosaic.version = 11 : i64} {
  func.func @fused_clf_kernel(%arg0: i32, %arg1: memref<512x1xf32, #tpu.memory_space<vmem>>, %arg2: memref<128x512xf32, #tpu.memory_space<vmem>>, %arg3: memref<1x32xf32, #tpu.memory_space<vmem>>, %arg4: memref<1x32xf32, #tpu.memory_space<vmem>>, %arg5: memref<32x128xf32, #tpu.memory_space<vmem>>, %arg6: memref<32x64xf32, #tpu.memory_space<vmem>>, %arg7: memref<1x64xf32, #tpu.memory_space<vmem>>, %arg8: memref<16x32xf32, #tpu.memory_space<vmem>>, %arg9: memref<64x128xf32, #tpu.memory_space<vmem>>, %arg10: memref<1x128xf32, #tpu.memory_space<vmem>>, %arg11: memref<128x40xf32, #tpu.memory_space<vmem>>, %arg12: memref<16x40xf32, #tpu.memory_space<vmem>>, %arg13: memref<2x16xf32, #tpu.memory_space<vmem>>, %arg14: memref<40x5xf32, #tpu.memory_space<vmem>>, %arg15: memref<1x5xf32, #tpu.memory_space<vmem>>, %arg16: memref<2x5xf32, #tpu.memory_space<vmem>>) attributes {dimension_semantics = [#tpu.dimension_semantics<arbitrary>], iteration_bounds = array<i64: 1>, scalar_prefetch = 0 : i64, scratch_operands = 0 : i64, tpu.core_type = #tpu.core_type<tc>, window_params = [{pipeline_mode = #tpu.pipeline_mode<synchronous>, transform_indices = @transform_0, window_bounds = array<i64: 512, 1>}, {pipeline_mode = #tpu.pipeline_mode<synchronous>, transform_indices = @transform_1, window_bounds = array<i64: 128, 512>}, {pipeline_mode = #tpu.pipeline_mode<synchronous>, transform_indices = @transform_2, window_bounds = array<i64: 1, 32>}, {pipeline_mode = #tpu.pipeline_mode<synchronous>, transform_indices = @transform_3, window_bounds = array<i64: 1, 32>}, {pipeline_mode = #tpu.pipeline_mode<synchronous>, transform_indices = @transform_4, window_bounds = array<i64: 32, 128>}, {pipeline_mode = #tpu.pipeline_mode<synchronous>, transform_indices = @transform_5, window_bounds = array<i64: 32, 64>}, {pipeline_mode = #tpu.pipeline_mode<synchronous>, transform_indices = @transform_6, window_bounds = array<i64: 1, 64>}, {pipeline_mode = #tpu.pipeline_mode<synchronous>, transform_indices = @transform_7, window_bounds = array<i64: 16, 32>}, {pipeline_mode = #tpu.pipeline_mode<synchronous>, transform_indices = @transform_8, window_bounds = array<i64: 64, 128>}, {pipeline_mode = #tpu.pipeline_mode<synchronous>, transform_indices = @transform_9, window_bounds = array<i64: 1, 128>}, {pipeline_mode = #tpu.pipeline_mode<synchronous>, transform_indices = @transform_10, window_bounds = array<i64: 128, 40>}, {pipeline_mode = #tpu.pipeline_mode<synchronous>, transform_indices = @transform_11, window_bounds = array<i64: 16, 40>}, {pipeline_mode = #tpu.pipeline_mode<synchronous>, transform_indices = @transform_12, window_bounds = array<i64: 2, 16>}, {pipeline_mode = #tpu.pipeline_mode<synchronous>, transform_indices = @transform_13, window_bounds = array<i64: 40, 5>}, {pipeline_mode = #tpu.pipeline_mode<synchronous>, transform_indices = @transform_14, window_bounds = array<i64: 1, 5>}, {pipeline_mode = #tpu.pipeline_mode<synchronous>, transform_indices = @transform_15, window_bounds = array<i64: 2, 5>}]} {
    %c0 = arith.constant 0 : index
    %c0_0 = arith.constant 0 : index
    %0 = vector.load %arg1[%c0, %c0_0] : memref<512x1xf32, #tpu.memory_space<vmem>>, vector<512x1xf32>
    %c0_1 = arith.constant 0 : index
    %c0_2 = arith.constant 0 : index
    %1 = vector.load %arg3[%c0_1, %c0_2] : memref<1x32xf32, #tpu.memory_space<vmem>>, vector<1x32xf32>
    %2 = vector.broadcast %0 : vector<512x1xf32> to vector<512x32xf32>
    %3 = vector.broadcast %1 : vector<1x32xf32> to vector<512x32xf32>
    %4 = arith.mulf %2, %3 : vector<512x32xf32>
    %c0_3 = arith.constant 0 : index
    %c0_4 = arith.constant 0 : index
    %5 = vector.load %arg2[%c0_3, %c0_4] : memref<128x512xf32, #tpu.memory_space<vmem>>, vector<128x512xf32>
    %cst = arith.constant dense<0.000000e+00> : vector<128x32xf32>
    %6 = tpu.matmul %5, %4, %cst {dimension_numbers = #tpu.dot_dimension_numbers<[1], [0], [0], [1], [0, 0, 1, 1], [], []>} : vector<128x512xf32>, vector<512x32xf32>, vector<128x32xf32> -> vector<128x32xf32>
    %c0_5 = arith.constant 0 : index
    %c0_6 = arith.constant 0 : index
    %7 = vector.load %arg4[%c0_5, %c0_6] : memref<1x32xf32, #tpu.memory_space<vmem>>, vector<1x32xf32>
    %8 = vector.broadcast %7 : vector<1x32xf32> to vector<128x32xf32>
    %9 = arith.addf %6, %8 : vector<128x32xf32>
    %c0_7 = arith.constant 0 : index
    %c0_8 = arith.constant 0 : index
    %10 = vector.load %arg5[%c0_7, %c0_8] : memref<32x128xf32, #tpu.memory_space<vmem>>, vector<32x128xf32>
    %cst_9 = arith.constant dense<0.000000e+00> : vector<32x32xf32>
    %11 = tpu.matmul %10, %9, %cst_9 {dimension_numbers = #tpu.dot_dimension_numbers<[1], [0], [0], [1], [0, 0, 1, 1], [], []>} : vector<32x128xf32>, vector<128x32xf32>, vector<32x32xf32> -> vector<32x32xf32>
    %c0_10 = arith.constant 0 : index
    %c0_11 = arith.constant 0 : index
    %12 = vector.load %arg6[%c0_10, %c0_11] : memref<32x64xf32, #tpu.memory_space<vmem>>, vector<32x64xf32>
    %cst_12 = arith.constant dense<0.000000e+00> : vector<32x64xf32>
    %13 = tpu.matmul %11, %12, %cst_12 {dimension_numbers = #tpu.dot_dimension_numbers<[1], [0], [0], [1], [0, 0, 1, 1], [], []>} : vector<32x32xf32>, vector<32x64xf32>, vector<32x64xf32> -> vector<32x64xf32>
    %c0_13 = arith.constant 0 : index
    %c0_14 = arith.constant 0 : index
    %14 = vector.load %arg7[%c0_13, %c0_14] : memref<1x64xf32, #tpu.memory_space<vmem>>, vector<1x64xf32>
    %15 = vector.broadcast %14 : vector<1x64xf32> to vector<32x64xf32>
    %16 = arith.addf %13, %15 : vector<32x64xf32>
    %c0_15 = arith.constant 0 : index
    %c0_16 = arith.constant 0 : index
    %17 = vector.load %arg8[%c0_15, %c0_16] : memref<16x32xf32, #tpu.memory_space<vmem>>, vector<16x32xf32>
    %cst_17 = arith.constant dense<0.000000e+00> : vector<16x64xf32>
    %18 = tpu.matmul %17, %16, %cst_17 {dimension_numbers = #tpu.dot_dimension_numbers<[1], [0], [0], [1], [0, 0, 1, 1], [], []>} : vector<16x32xf32>, vector<32x64xf32>, vector<16x64xf32> -> vector<16x64xf32>
    %c0_18 = arith.constant 0 : index
    %c0_19 = arith.constant 0 : index
    %19 = vector.load %arg9[%c0_18, %c0_19] : memref<64x128xf32, #tpu.memory_space<vmem>>, vector<64x128xf32>
    %cst_20 = arith.constant dense<0.000000e+00> : vector<16x128xf32>
    %20 = tpu.matmul %18, %19, %cst_20 {dimension_numbers = #tpu.dot_dimension_numbers<[1], [0], [0], [1], [0, 0, 1, 1], [], []>} : vector<16x64xf32>, vector<64x128xf32>, vector<16x128xf32> -> vector<16x128xf32>
    %c0_21 = arith.constant 0 : index
    %c0_22 = arith.constant 0 : index
    %21 = vector.load %arg10[%c0_21, %c0_22] : memref<1x128xf32, #tpu.memory_space<vmem>>, vector<1x128xf32>
    %22 = vector.broadcast %21 : vector<1x128xf32> to vector<16x128xf32>
    %23 = arith.addf %20, %22 : vector<16x128xf32>
    %c0_23 = arith.constant 0 : index
    %c0_24 = arith.constant 0 : index
    %24 = vector.load %arg11[%c0_23, %c0_24] : memref<128x40xf32, #tpu.memory_space<vmem>>, vector<128x40xf32>
    %cst_25 = arith.constant dense<0.000000e+00> : vector<16x40xf32>
    %25 = tpu.matmul %23, %24, %cst_25 {dimension_numbers = #tpu.dot_dimension_numbers<[1], [0], [0], [1], [0, 0, 1, 1], [], []>} : vector<16x128xf32>, vector<128x40xf32>, vector<16x40xf32> -> vector<16x40xf32>
    %c0_26 = arith.constant 0 : index
    %c0_27 = arith.constant 0 : index
    %26 = vector.load %arg12[%c0_26, %c0_27] : memref<16x40xf32, #tpu.memory_space<vmem>>, vector<16x40xf32>
    %27 = arith.mulf %25, %26 : vector<16x40xf32>
    %c0_28 = arith.constant 0 : index
    %c0_29 = arith.constant 0 : index
    %28 = vector.load %arg14[%c0_28, %c0_29] : memref<40x5xf32, #tpu.memory_space<vmem>>, vector<40x5xf32>
    %cst_30 = arith.constant dense<0.000000e+00> : vector<16x5xf32>
    %29 = tpu.matmul %27, %28, %cst_30 {dimension_numbers = #tpu.dot_dimension_numbers<[1], [0], [0], [1], [0, 0, 1, 1], [], []>} : vector<16x40xf32>, vector<40x5xf32>, vector<16x5xf32> -> vector<16x5xf32>
    %c0_31 = arith.constant 0 : index
    %c0_32 = arith.constant 0 : index
    %30 = vector.load %arg13[%c0_31, %c0_32] : memref<2x16xf32, #tpu.memory_space<vmem>>, vector<2x16xf32>
    %cst_33 = arith.constant dense<0.000000e+00> : vector<2x5xf32>
    %31 = tpu.matmul %30, %29, %cst_33 {dimension_numbers = #tpu.dot_dimension_numbers<[1], [0], [0], [1], [0, 0, 1, 1], [], []>} : vector<2x16xf32>, vector<16x5xf32>, vector<2x5xf32> -> vector<2x5xf32>
    %c0_34 = arith.constant 0 : index
    %c0_35 = arith.constant 0 : index
    %32 = vector.load %arg15[%c0_34, %c0_35] : memref<1x5xf32, #tpu.memory_space<vmem>>, vector<1x5xf32>
    %33 = vector.broadcast %32 : vector<1x5xf32> to vector<2x5xf32>
    %34 = arith.addf %31, %33 : vector<2x5xf32>
    %c0_36 = arith.constant 0 : index
    %c0_37 = arith.constant 0 : index
    %35 = vector.load %arg16[%c0_36, %c0_37] : memref<2x5xf32, #tpu.memory_space<vmem>>, vector<2x5xf32>
    tpu.vector_store %arg16[%c0_36, %c0_37], %34 {strides = array<i32>} : memref<2x5xf32, #tpu.memory_space<vmem>>, vector<2x5xf32>,
    return
  }
  func.func @transform_0(%arg0: i32) -> (i32, i32) {
    %c0_i32 = arith.constant 0 : i32
    %c0_i32_0 = arith.constant 0 : i32
    %c0_i32_1 = arith.constant 0 : i32
    return %c0_i32, %c0_i32_0 : i32, i32
  }
  func.func @transform_1(%arg0: i32) -> (i32, i32) {
    %c0_i32 = arith.constant 0 : i32
    %c0_i32_0 = arith.constant 0 : i32
    %c0_i32_1 = arith.constant 0 : i32
    return %c0_i32, %c0_i32_0 : i32, i32
  }
  func.func @transform_2(%arg0: i32) -> (i32, i32) {
    %c0_i32 = arith.constant 0 : i32
    %c0_i32_0 = arith.constant 0 : i32
    %c0_i32_1 = arith.constant 0 : i32
    return %c0_i32, %c0_i32_0 : i32, i32
  }
  func.func @transform_3(%arg0: i32) -> (i32, i32) {
    %c0_i32 = arith.constant 0 : i32
    %c0_i32_0 = arith.constant 0 : i32
    %c0_i32_1 = arith.constant 0 : i32
    return %c0_i32, %c0_i32_0 : i32, i32
  }
  func.func @transform_4(%arg0: i32) -> (i32, i32) {
    %c0_i32 = arith.constant 0 : i32
    %c0_i32_0 = arith.constant 0 : i32
    %c0_i32_1 = arith.constant 0 : i32
    return %c0_i32, %c0_i32_0 : i32, i32
  }
  func.func @transform_5(%arg0: i32) -> (i32, i32) {
    %c0_i32 = arith.constant 0 : i32
    %c0_i32_0 = arith.constant 0 : i32
    %c0_i32_1 = arith.constant 0 : i32
    return %c0_i32, %c0_i32_0 : i32, i32
  }
  func.func @transform_6(%arg0: i32) -> (i32, i32) {
    %c0_i32 = arith.constant 0 : i32
    %c0_i32_0 = arith.constant 0 : i32
    %c0_i32_1 = arith.constant 0 : i32
    return %c0_i32, %c0_i32_0 : i32, i32
  }
  func.func @transform_7(%arg0: i32) -> (i32, i32) {
    %c0_i32 = arith.constant 0 : i32
    %c0_i32_0 = arith.constant 0 : i32
    %c0_i32_1 = arith.constant 0 : i32
    return %c0_i32, %c0_i32_0 : i32, i32
  }
  func.func @transform_8(%arg0: i32) -> (i32, i32) {
    %c0_i32 = arith.constant 0 : i32
    %c0_i32_0 = arith.constant 0 : i32
    %c0_i32_1 = arith.constant 0 : i32
    return %c0_i32, %c0_i32_0 : i32, i32
  }
  func.func @transform_9(%arg0: i32) -> (i32, i32) {
    %c0_i32 = arith.constant 0 : i32
    %c0_i32_0 = arith.constant 0 : i32
    %c0_i32_1 = arith.constant 0 : i32
    return %c0_i32, %c0_i32_0 : i32, i32
  }
  func.func @transform_10(%arg0: i32) -> (i32, i32) {
    %c0_i32 = arith.constant 0 : i32
    %c0_i32_0 = arith.constant 0 : i32
    %c0_i32_1 = arith.constant 0 : i32
    return %c0_i32, %c0_i32_0 : i32, i32
  }
  func.func @transform_11(%arg0: i32) -> (i32, i32) {
    %c0_i32 = arith.constant 0 : i32
    %c0_i32_0 = arith.constant 0 : i32
    %c0_i32_1 = arith.constant 0 : i32
    return %c0_i32, %c0_i32_0 : i32, i32
  }
  func.func @transform_12(%arg0: i32) -> (i32, i32) {
    %c0_i32 = arith.constant 0 : i32
    %c0_i32_0 = arith.constant 0 : i32
    %c0_i32_1 = arith.constant 0 : i32
    return %c0_i32, %c0_i32_0 : i32, i32
  }
  func.func @transform_13(%arg0: i32) -> (i32, i32) {
    %c0_i32 = arith.constant 0 : i32
    %c0_i32_0 = arith.constant 0 : i32
    %c0_i32_1 = arith.constant 0 : i32
    return %c0_i32, %c0_i32_0 : i32, i32
  }
  func.func @transform_14(%arg0: i32) -> (i32, i32) {
    %c0_i32 = arith.constant 0 : i32
    %c0_i32_0 = arith.constant 0 : i32
    %c0_i32_1 = arith.constant 0 : i32
    return %c0_i32, %c0_i32_0 : i32, i32
  }
  func.func @transform_15(%arg0: i32) -> (i32, i32) {
    %c0_i32 = arith.constant 0 : i32
    %c0_i32_0 = arith.constant 0 : i32
    %c0_i32_1 = arith.constant 0 : i32
    return %c0_i32, %c0_i32_0 : i32, i32
  }
}

</mosaic_0001>

<bundles_post_ra>
// kernel: tpu_custom_call.1
= control target key start
LH: loop header
LB: loop body
LE: loop exit
PB: predicated region body
PF: predicated region fallthrough
CT: control target
= control target key end

     0   :  { %v2112_v2 = vmov 0   ;;  %s2824_s0 = inlined_call_operand.vmem [shape: f32[512,1], index: 0, kind: input, shape index: {}]   ;;  %s2825_s1 = inlined_call_operand.vmem [shape: f32[128,512], index: 1, kind: input, shape index: {}]   ;;  %s2826_s2 = inlined_call_operand.vmem [shape: f32[1,32], index: 2, kind: input, shape index: {}]   ;;  %s2827_s3 = inlined_call_operand.vmem [shape: f32[1,32], index: 3, kind: input, shape index: {}]   ;;  %s2828_s4 = inlined_call_operand.vmem [shape: f32[32,128], index: 4, kind: input, shape index: {}]   ;;  %s2829_s5 = inlined_call_operand.vmem [shape: f32[32,64], index: 5, kind: input, shape index: {}]   ;;  %s2830_s6 = inlined_call_operand.vmem [shape: f32[1,64], index: 6, kind: input, shape index: {}]   ;;  %s2831_s7 = inlined_call_operand.vmem [shape: f32[16,32], index: 7, kind: input, shape index: {}]   ;;  %s2832_s8 = inlined_call_operand.vmem [shape: f32[64,128], index: 8, kind: input, shape index: {}]   ;;  %s2833_s9 = inlined_call_operand.vmem [shape: f32[1,128], index: 9, kind: input, shape index: {}]   ;;  %s2834_s10 = inlined_call_operand.vmem [shape: f32[128,40], index: 10, kind: input, shape index: {}]   ;;  %s2835_s11 = inlined_call_operand.vmem [shape: f32[16,40], index: 11, kind: input, shape index: {}]   ;;  %s2836_s12 = inlined_call_operand.vmem [shape: f32[2,16], index: 12, kind: input, shape index: {}]   ;;  %s2837_s13 = inlined_call_operand.vmem [shape: f32[40,5], index: 13, kind: input, shape index: {}]   ;;  %s2838_s14 = inlined_call_operand.vmem [shape: f32[1,5], index: 14, kind: input, shape index: {}]   ;;  %s2839_s15 = inlined_call_operand.hbm [shape: f32[2,5], index: 15, kind: output, shape index: {}]  }
   0x1   :  { %v67_v0 = vld [vmem:[%s2824_s0 + $0x80] sm:$0xff]  ;;  %2087 = vset.pattern.permute.xlu1 %v2112_v2  ;;  %2086 = vset.pattern.permute.xlu0 %v2112_v2  ;;  %v68_v3 = vld [vmem:[%s2824_s0 + $0x88] sm:$0xff]  ;;  %v69_v9 = vld [vmem:[%s2824_s0 + $0x90] sm:$0xff] }
   0x2   :  { %v51_v1 = vld [vmem:[%s2824_s0] sm:$0xff]  ;;  %198 = vperm.xlu0 %2086, %v67_v0   ;;  %v52_v4 = vld [vmem:[%s2824_s0 + $0x8] sm:$0xff]  ;;  %v70_v10 = vld [vmem:[%s2824_s0 + $0x98] sm:$0xff] }
   0x3   :  { %118 = vperm.xlu1 %2087, %v51_v1   ;;  %v99_v5 = vld [vmem:[%s2824_s0 + $0x180] sm:$0xff]  ;;  %v100_v6 = vld [vmem:[%s2824_s0 + $0x188] sm:$0xff]  ;;  %v53_v11 = vld [vmem:[%s2824_s0 + $0x10] sm:$0xff] }
   0x4   :  { %v83_v7 = vld [vmem:[%s2824_s0 + $0x100] sm:$0xff]  ;;  %v84_v8 = vld [vmem:[%s2824_s0 + $0x108] sm:$0xff]  ;;  %v54_v12 = vld [vmem:[%s2824_s0 + $0x18] sm:$0xff] }
   0x6   :  { %203 = vperm.xlu0 %2086, %v68_v3  }
   0x7   :  { %123 = vperm.xlu1 %2087, %v52_v4  }
   0xa   :  { %358 = vperm.xlu0 %2086, %v99_v5  }
   0xb   :  { %363 = vperm.xlu1 %2087, %v100_v6  }
   0xe   :  { %278 = vperm.xlu0 %2086, %v83_v7  }
   0xf   :  { %283 = vperm.xlu1 %2087, %v84_v8  }
  0x12   :  { %208 = vperm.xlu0 %2086, %v69_v9  }
  0x13   :  { %213 = vperm.xlu1 %2087, %v70_v10  }
  0x14   :  { %20 = vsyncpa [#allocation3], 0  ;;  %v101_v13 = vld [vmem:[%s2824_s0 + $0x190] sm:$0xff]  ;;  %v102_v14 = vld [vmem:[%s2824_s0 + $0x198] sm:$0xff]  ;;  %vm967_vm0 = vcmask 261120   ;;  %vm1163_vm1 = vcmask 523264  }
  0x15   :  { %v85_v15 = vld [vmem:[%s2824_s0 + $0x110] sm:$0xff]  ;;  %v86_v16 = vld [vmem:[%s2824_s0 + $0x118] sm:$0xff]  ;;  %v71_v17 = vld [vmem:[%s2824_s0 + $0xa0] sm:$0xff]  ;;  %vm1345_vm2 = vcmask 326656   ;;  %vm2114_vm3 = vmmov 0   ;;  %vm1435_vm4 = vcmask 130048  }
  0x16   :  { %128 = vperm.xlu0 %2086, %v53_v11   ;;  %v72_v18 = vld [vmem:[%s2824_s0 + $0xa8] sm:$0xff]  ;;  %v55_v19 = vld [vmem:[%s2824_s0 + $0x20] sm:$0xff]  ;;  %v73_v25 = vld [vmem:[%s2824_s0 + $0xb0] sm:$0xff]  ;;  %vm1509_vm5 = vcmask 33792  }
  0x17   :  { %133 = vperm.xlu1 %2087, %v54_v12   ;;  %v56_v20 = vld [vmem:[%s2824_s0 + $0x28] sm:$0xff]  ;;  %v103_v21 = vld [vmem:[%s2824_s0 + $0x1a0] sm:$0xff]  ;;  %v74_v26 = vld [vmem:[%s2824_s0 + $0xb8] sm:$0xff] }
  0x18   :  { %v104_v22 = vld [vmem:[%s2824_s0 + $0x1a8] sm:$0xff]  ;;  %v87_v23 = vld [vmem:[%s2824_s0 + $0x120] sm:$0xff]  ;;  %v57_v27 = vld [vmem:[%s2824_s0 + $0x30] sm:$0xff] }
  0x19   :  { %v88_v24 = vld [vmem:[%s2824_s0 + $0x128] sm:$0xff]  ;;  %v58_v28 = vld [vmem:[%s2824_s0 + $0x38] sm:$0xff]  ;;  %v105_v29 = vld [vmem:[%s2824_s0 + $0x1b0] sm:$0xff] }
  0x1a   :  { %368 = vperm.xlu0 %2086, %v101_v13   ;;  %v106_v30 = vld [vmem:[%s2824_s0 + $0x1b8] sm:$0xff]  ;;  %v89_v31 = vld [vmem:[%s2824_s0 + $0x130] sm:$0xff]  ;;  %v75_v33 = vld [vmem:[%s2824_s0 + $0xc0] sm:$0xff] }
  0x1b   :  { %373 = vperm.xlu1 %2087, %v102_v14   ;;  %v90_v32 = vld [vmem:[%s2824_s0 + $0x138] sm:$0xff]  ;;  %v76_v34 = vld [vmem:[%s2824_s0 + $0xc8] sm:$0xff]  ;;  %v59_v35 = vld [vmem:[%s2824_s0 + $0x40] sm:$0xff] }
  0x1c   :  { %v60_v36 = vld [vmem:[%s2824_s0 + $0x48] sm:$0xff]  ;;  %v107_v37 = vld [vmem:[%s2824_s0 + $0x1c0] sm:$0xff]  ;;  %v77_v41 = vld [vmem:[%s2824_s0 + $0xd0] sm:$0xff] }
  0x1d   :  { %v108_v38 = vld [vmem:[%s2824_s0 + $0x1c8] sm:$0xff]  ;;  %v91_v39 = vld [vmem:[%s2824_s0 + $0x140] sm:$0xff]  ;;  %v78_v42 = vld [vmem:[%s2824_s0 + $0xd8] sm:$0xff] }
  0x1e   :  { %288 = vperm.xlu0 %2086, %v85_v15   ;;  %v92_v40 = vld [vmem:[%s2824_s0 + $0x148] sm:$0xff]  ;;  %v61_v43 = vld [vmem:[%s2824_s0 + $0x50] sm:$0xff]  ;;  %v62_v44 = vld [vmem:[%s2824_s0 + $0x58] sm:$0xff] }
  0x1f   :  { %293 = vperm.xlu1 %2087, %v86_v16   ;;  %v109_v45 = vld [vmem:[%s2824_s0 + $0x1d0] sm:$0xff]  ;;  %v110_v46 = vld [vmem:[%s2824_s0 + $0x1d8] sm:$0xff]  ;;  %v79_v49 = vld [vmem:[%s2824_s0 + $0xe0] sm:$0xff] }
  0x20   :  { %v93_v47 = vld [vmem:[%s2824_s0 + $0x150] sm:$0xff]  ;;  %v94_v48 = vld [vmem:[%s2824_s0 + $0x158] sm:$0xff]  ;;  %v80_v50 = vld [vmem:[%s2824_s0 + $0xe8] sm:$0xff] }
  0x21   :  { %v63_v51 = vld [vmem:[%s2824_s0 + $0x60] sm:$0xff]  ;;  %v64_v52 = vld [vmem:[%s2824_s0 + $0x68] sm:$0xff]  ;;  %v81_v57 = vld [vmem:[%s2824_s0 + $0xf0] sm:$0xff] }
  0x22   :  { %218 = vperm.xlu0 %2086, %v71_v17   ;;  %v111_v53 = vld [vmem:[%s2824_s0 + $0x1e0] sm:$0xff]  ;;  %v112_v54 = vld [vmem:[%s2824_s0 + $0x1e8] sm:$0xff]  ;;  %v82_v58 = vld [vmem:[%s2824_s0 + $0xf8] sm:$0xff] }
  0x23   :  { %223 = vperm.xlu1 %2087, %v72_v18   ;;  %v95_v55 = vld [vmem:[%s2824_s0 + $0x160] sm:$0xff]  ;;  %v96_v56 = vld [vmem:[%s2824_s0 + $0x168] sm:$0xff]  ;;  %v65_v59 = vld [vmem:[%s2824_s0 + $0x70] sm:$0xff] }
  0x24   :  { %v66_v60 = vld [vmem:[%s2824_s0 + $0x78] sm:$0xff]  ;;  %v113_v61 = vld [vmem:[%s2824_s0 + $0x1f0] sm:$0xff]  ;;  %v507_v1 = vld [vmem:[%s2825_s1 + $0x8] sm:$0xff] }
  0x25   :  { %v114_v62 = vld [vmem:[%s2824_s0 + $0x1f8] sm:$0xff]  ;;  %v97_v63 = vld [vmem:[%s2824_s0 + $0x170] sm:$0xff]  ;;  %641 = vmatprep.mubr.f32.mxu0 %v507_v1  ;;  %v2398_v5 = vld [vmem:[%s2826_s2] ss:$0 sm:$0xff] }
  0x26   :  { %138 = vperm.xlu0 %2086, %v55_v19   ;;  %v98_v0 = vld [vmem:[%s2824_s0 + $0x178] sm:$0xff] }
  0x27   :  { %143 = vperm.xlu1 %2087, %v56_v20   ;;  %v509_v4 = vld [vmem:[%s2825_s1 + $0x18] sm:$0xff] }
  0x28   :  { %786 = vmatprep.mubr.f32.mxu1 %v509_v4 }
  0x2a   :  { %378 = vperm.xlu0 %2086, %v103_v21  }
  0x2b   :  { %383 = vperm.xlu1 %2087, %v104_v22  }
  0x2e   :  { %298 = vperm.xlu0 %2086, %v87_v23  }
  0x2f   :  { %303 = vperm.xlu1 %2087, %v88_v24  }
  0x32   :  { %228 = vperm.xlu0 %2086, %v73_v25  }
  0x33   :  { %233 = vperm.xlu1 %2087, %v74_v26  }
  0x36   :  { %148 = vperm.xlu0 %2086, %v57_v27  }
  0x37   :  { %153 = vperm.xlu1 %2087, %v58_v28  }
  0x3a   :  { %388 = vperm.xlu0 %2086, %v105_v29  }
  0x3b   :  { %393 = vperm.xlu1 %2087, %v106_v30  }
  0x3e   :  { %308 = vperm.xlu0 %2086, %v89_v31  }
  0x3f   :  { %313 = vperm.xlu1 %2087, %v90_v32  }
  0x42   :  { %238 = vperm.xlu0 %2086, %v75_v33  }
  0x43   :  { %243 = vperm.xlu1 %2087, %v76_v34  }
  0x46   :  { %158 = vperm.xlu0 %2086, %v59_v35  }
  0x47   :  { %163 = vperm.xlu1 %2087, %v60_v36  }
  0x4a   :  { %398 = vperm.xlu0 %2086, %v107_v37  }
  0x4b   :  { %403 = vperm.xlu1 %2087, %v108_v38  }
  0x4e   :  { %318 = vperm.xlu0 %2086, %v91_v39  }
  0x4f   :  { %323 = vperm.xlu1 %2087, %v92_v40  }
  0x52   :  { %248 = vperm.xlu0 %2086, %v77_v41  }
  0x53   :  { %253 = vperm.xlu1 %2087, %v78_v42  }
  0x56   :  { %168 = vperm.xlu0 %2086, %v61_v43  }
  0x57   :  { %173 = vperm.xlu1 %2087, %v62_v44  }
  0x5a   :  { %408 = vperm.xlu0 %2086, %v109_v45  }
  0x5b   :  { %413 = vperm.xlu1 %2087, %v110_v46  }
  0x5e   :  { %328 = vperm.xlu0 %2086, %v93_v47  }
  0x5f   :  { %333 = vperm.xlu1 %2087, %v94_v48  }
  0x62   :  { %258 = vperm.xlu0 %2086, %v79_v49  }
  0x63   :  { %263 = vperm.xlu1 %2087, %v80_v50  }
  0x66   :  { %178 = vperm.xlu0 %2086, %v63_v51  }
  0x67   :  { %183 = vperm.xlu1 %2087, %v64_v52  }
  0x6a   :  { %418 = vperm.xlu0 %2086, %v111_v53  }
  0x6b   :  { %423 = vperm.xlu1 %2087, %v112_v54  }
  0x6e   :  { %338 = vperm.xlu0 %2086, %v95_v55  }
  0x6f   :  { %343 = vperm.xlu1 %2087, %v96_v56  }
  0x72   :  { %268 = vperm.xlu0 %2086, %v81_v57  }
  0x73   :  { %273 = vperm.xlu1 %2087, %v82_v58  }
  0x76   :  { %188 = vperm.xlu0 %2086, %v65_v59  }
  0x77   :  { %193 = vperm.xlu1 %2087, %v66_v60  }
  0x7a   :  { %428 = vperm.xlu0 %2086, %v113_v61  }
  0x7b   :  { %433 = vperm.xlu1 %2087, %v114_v62  }
  0x7e   :  { %348 = vperm.xlu0 %2086, %v97_v63  }
  0x7f   :  { %353 = vperm.xlu1 %2087, %v98_v0  }
  0x81   :  { %v199_v2 = vpop.permute.xlu0 %198 }
  0x82   :  { %v119_v3 = vpop.permute.xlu1 %118  ;;  %v458_v8 = vmul.f32 %v2398_v5, %v199_v2 }
  0x83   :  { %v442_v9 = vmul.f32 %v2398_v5, %v119_v3 }
  0x85   :  { %v204_v6 = vpop.permute.xlu0 %203 }
  0x86   :  { %v124_v7 = vpop.permute.xlu1 %123  ;;  %v459_v10 = vmul.f32 %v2398_v5, %v204_v6 }
  0x87   :  { %v443_v11 = vmul.f32 %v2398_v5, %v124_v7 }
  0x88   :  { %v1910_v12 = vpack.c.bf16 %v459_v10, %v458_v8 }
  0x89   :  { %v1912_v13 = vpack.c.bf16 %v443_v11, %v442_v9  ;;  %v359_v14 = vpop.permute.xlu0 %358 }
  0x8a   :  { %v364_v15 = vpop.permute.xlu1 %363  ;;  %v490_v16 = vmul.f32 %v2398_v5, %v359_v14  ;;  %1911 = vmatprep.subr.bf16.mxu0 %v1910_v12 }
  0x8b   :  { %v491_v17 = vmul.f32 %v2398_v5, %v364_v15  ;;  %1913 = vmatpush3.bf16.msra.mxu0 %v1912_v13 }
  0x8d   :  { %v1942_v18 = vpack.c.bf16 %v491_v17, %v490_v16  ;;  %v279_v19 = vpop.permute.xlu0 %278 }
  0x8e   :  { %v284_v20 = vpop.permute.xlu1 %283  ;;  %v474_v21 = vmul.f32 %v2398_v5, %v279_v19 }
  0x8f   :  { %v475_v22 = vmul.f32 %v2398_v5, %v284_v20  ;;  %1943 = vmatprep.subr.bf16.mxu1 %v1942_v18 }
  0x91   :  { %v1944_v23 = vpack.c.bf16 %v475_v22, %v474_v21  ;;  %v209_v24 = vpop.permute.xlu0 %208 }
  0x92   :  { %v214_v25 = vpop.permute.xlu1 %213  ;;  %v460_v26 = vmul.f32 %v2398_v5, %v209_v24 }
  0x93   :  { %v461_v27 = vmul.f32 %v2398_v5, %v214_v25  ;;  %1945 = vmatpush3.bf16.msra.mxu1 %v1944_v23 }
  0x95   :  { %v1914_v28 = vpack.c.bf16 %v461_v27, %v460_v26  ;;  %v129_v29 = vpop.permute.xlu0 %128 }
  0x96   :  { %v134_v30 = vpop.permute.xlu1 %133  ;;  %v444_v31 = vmul.f32 %v2398_v5, %v129_v29 }
  0x97   :  { %v445_v32 = vmul.f32 %v2398_v5, %v134_v30  ;;  %1915 = vmatprep.subr.bf16.mxu0 %v1914_v28 }
  0x99   :  { %v1916_v33 = vpack.c.bf16 %v445_v32, %v444_v31  ;;  %v369_v34 = vpop.permute.xlu0 %368 }
  0x9a   :  { %v374_v35 = vpop.permute.xlu1 %373  ;;  %v492_v36 = vmul.f32 %v2398_v5, %v369_v34 }
  0x9b   :  { %v493_v37 = vmul.f32 %v2398_v5, %v374_v35  ;;  %1917 = vmatpush3.bf16.msra.mxu0 %v1916_v33 }
  0x9d   :  { %v1946_v38 = vpack.c.bf16 %v493_v37, %v492_v36  ;;  %v289_v39 = vpop.permute.xlu0 %288 }
  0x9e   :  { %v294_v40 = vpop.permute.xlu1 %293  ;;  %v476_v41 = vmul.f32 %v2398_v5, %v289_v39 }
  0x9f   :  { %v477_v42 = vmul.f32 %v2398_v5, %v294_v40  ;;  %1947 = vmatprep.subr.bf16.mxu1 %v1946_v38 }
  0xa1   :  { %v1948_v43 = vpack.c.bf16 %v477_v42, %v476_v41  ;;  %v219_v44 = vpop.permute.xlu0 %218 }
  0xa2   :  { %v224_v45 = vpop.permute.xlu1 %223  ;;  %v462_v46 = vmul.f32 %v2398_v5, %v219_v44 }
  0xa3   :  { %v463_v47 = vmul.f32 %v2398_v5, %v224_v45  ;;  %1949 = vmatpush3.bf16.msra.mxu1 %v1948_v43 }
  0xa5   :  { %v1918_v48 = vpack.c.bf16 %v463_v47, %v462_v46  ;;  %v139_v49 = vpop.permute.xlu0 %138 }
  0xa6   :  { %v144_v50 = vpop.permute.xlu1 %143  ;;  %v446_v51 = vmul.f32 %v2398_v5, %v139_v49 }
  0xa7   :  { %v447_v52 = vmul.f32 %v2398_v5, %v144_v50  ;;  %1919 = vmatprep.subr.bf16.mxu0 %v1918_v48 }
  0xa9   :  { %v1920_v53 = vpack.c.bf16 %v447_v52, %v446_v51  ;;  %v379_v54 = vpop.permute.xlu0 %378 }
  0xaa   :  { %v384_v55 = vpop.permute.xlu1 %383  ;;  %v494_v56 = vmul.f32 %v2398_v5, %v379_v54 }
  0xab   :  { %v495_v57 = vmul.f32 %v2398_v5, %v384_v55  ;;  %1921 = vmatpush3.bf16.msra.mxu0 %v1920_v53 }
  0xad   :  { %v1950_v58 = vpack.c.bf16 %v495_v57, %v494_v56  ;;  %v299_v59 = vpop.permute.xlu0 %298 }
  0xae   :  { %v304_v60 = vpop.permute.xlu1 %303  ;;  %v478_v61 = vmul.f32 %v2398_v5, %v299_v59 }
  0xaf   :  { %v479_v62 = vmul.f32 %v2398_v5, %v304_v60  ;;  %1951 = vmatprep.subr.bf16.mxu1 %v1950_v58 }
  0xb1   :  { %v1952_v63 = vpack.c.bf16 %v479_v62, %v478_v61  ;;  %v229_v0 = vpop.permute.xlu0 %228 }
  0xb2   :  { %v234_v1 = vpop.permute.xlu1 %233  ;;  %v464_v2 = vmul.f32 %v2398_v5, %v229_v0 }
  0xb3   :  { %v465_v3 = vmul.f32 %v2398_v5, %v234_v1  ;;  %1953 = vmatpush3.bf16.msra.mxu1 %v1952_v63 }
  0xb5   :  { %v1922_v4 = vpack.c.bf16 %v465_v3, %v464_v2  ;;  %v149_v6 = vpop.permute.xlu0 %148 }
  0xb6   :  { %v154_v7 = vpop.permute.xlu1 %153  ;;  %v448_v8 = vmul.f32 %v2398_v5, %v149_v6 }
  0xb7   :  { %v449_v9 = vmul.f32 %v2398_v5, %v154_v7  ;;  %1923 = vmatprep.subr.bf16.mxu0 %v1922_v4 }
  0xb9   :  { %v1924_v10 = vpack.c.bf16 %v449_v9, %v448_v8  ;;  %v389_v11 = vpop.permute.xlu0 %388 }
  0xba   :  { %v394_v12 = vpop.permute.xlu1 %393  ;;  %v496_v13 = vmul.f32 %v2398_v5, %v389_v11 }
  0xbb   :  { %v497_v14 = vmul.f32 %v2398_v5, %v394_v12  ;;  %1925 = vmatpush3.bf16.msra.mxu0 %v1924_v10 }
  0xbd   :  { %v1954_v15 = vpack.c.bf16 %v497_v14, %v496_v13  ;;  %v309_v16 = vpop.permute.xlu0 %308 }
  0xbe   :  { %v314_v17 = vpop.permute.xlu1 %313  ;;  %v480_v18 = vmul.f32 %v2398_v5, %v309_v16 }
  0xbf   :  { %v481_v19 = vmul.f32 %v2398_v5, %v314_v17  ;;  %1955 = vmatprep.subr.bf16.mxu1 %v1954_v15 }
  0xc1   :  { %v1956_v20 = vpack.c.bf16 %v481_v19, %v480_v18  ;;  %v239_v21 = vpop.permute.xlu0 %238 }
  0xc2   :  { %v244_v22 = vpop.permute.xlu1 %243  ;;  %v466_v23 = vmul.f32 %v2398_v5, %v239_v21 }
  0xc3   :  { %v467_v24 = vmul.f32 %v2398_v5, %v244_v22  ;;  %1957 = vmatpush3.bf16.msra.mxu1 %v1956_v20 }
  0xc5   :  { %v1926_v25 = vpack.c.bf16 %v467_v24, %v466_v23  ;;  %v159_v26 = vpop.permute.xlu0 %158 }
  0xc6   :  { %v164_v27 = vpop.permute.xlu1 %163  ;;  %v450_v28 = vmul.f32 %v2398_v5, %v159_v26 }
  0xc7   :  { %v451_v29 = vmul.f32 %v2398_v5, %v164_v27  ;;  %1927 = vmatprep.subr.bf16.mxu0 %v1926_v25 }
  0xc9   :  { %v1928_v30 = vpack.c.bf16 %v451_v29, %v450_v28  ;;  %v399_v31 = vpop.permute.xlu0 %398 }
  0xca   :  { %v404_v32 = vpop.permute.xlu1 %403  ;;  %v498_v33 = vmul.f32 %v2398_v5, %v399_v31 }
  0xcb   :  { %v499_v34 = vmul.f32 %v2398_v5, %v404_v32  ;;  %1929 = vmatpush3.bf16.msra.mxu0 %v1928_v30  ;;  %v506_v32 = vld [vmem:[%s2825_s1] sm:$0xff] }
  0xcd   :  { %v1958_v35 = vpack.c.bf16 %v499_v34, %v498_v33  ;;  %v319_v36 = vpop.permute.xlu0 %318  ;;  %v511_v33 = vld [vmem:[%s2825_s1 + $0x28] sm:$0xff] }
  0xce   :  { %v324_v37 = vpop.permute.xlu1 %323  ;;  %v482_v38 = vmul.f32 %v2398_v5, %v319_v36 }
  0xcf   :  { %v483_v39 = vmul.f32 %v2398_v5, %v324_v37  ;;  %1959 = vmatprep.subr.bf16.mxu1 %v1958_v35 }
  0xd1   :  { %v1960_v40 = vpack.c.bf16 %v483_v39, %v482_v38  ;;  %v249_v41 = vpop.permute.xlu0 %248  ;;  %v510_v39 = vld [vmem:[%s2825_s1 + $0x20] sm:$0xff] }
  0xd2   :  { %v254_v42 = vpop.permute.xlu1 %253  ;;  %v468_v43 = vmul.f32 %v2398_v5, %v249_v41 }
  0xd3   :  { %v469_v44 = vmul.f32 %v2398_v5, %v254_v42  ;;  %1961 = vmatpush3.bf16.msra.mxu1 %v1960_v40  ;;  %v515_v40 = vld [vmem:[%s2825_s1 + $0x48] sm:$0xff]  ;;  %v508_v42 = vld [vmem:[%s2825_s1 + $0x10] sm:$0xff] }
  0xd5   :  { %v1930_v45 = vpack.c.bf16 %v469_v44, %v468_v43  ;;  %v169_v46 = vpop.permute.xlu0 %168  ;;  %v513_v43 = vld [vmem:[%s2825_s1 + $0x38] sm:$0xff]  ;;  %v519_v44 = vld [vmem:[%s2825_s1 + $0x68] sm:$0xff] }
  0xd6   :  { %v174_v47 = vpop.permute.xlu1 %173  ;;  %v452_v48 = vmul.f32 %v2398_v5, %v169_v46  ;;  %v518_v46 = vld [vmem:[%s2825_s1 + $0x60] sm:$0xff] }
  0xd7   :  { %v453_v49 = vmul.f32 %v2398_v5, %v174_v47  ;;  %1931 = vmatprep.subr.bf16.mxu0 %v1930_v45  ;;  %v512_v45 = vld [vmem:[%s2825_s1 + $0x30] sm:$0xff]  ;;  %v517_v47 = vld [vmem:[%s2825_s1 + $0x58] sm:$0xff] }
  0xd9   :  { %v1932_v50 = vpack.c.bf16 %v453_v49, %v452_v48  ;;  %v409_v51 = vpop.permute.xlu0 %408  ;;  %v523_v48 = vld [vmem:[%s2825_s1 + $0x88] sm:$0xff]  ;;  %v516_v49 = vld [vmem:[%s2825_s1 + $0x50] sm:$0xff] }
  0xda   :  { %v414_v52 = vpop.permute.xlu1 %413  ;;  %v500_v53 = vmul.f32 %v2398_v5, %v409_v51  ;;  %v521_v51 = vld [vmem:[%s2825_s1 + $0x78] sm:$0xff] }
  0xdb   :  { %v501_v54 = vmul.f32 %v2398_v5, %v414_v52  ;;  %1933 = vmatpush3.bf16.msra.mxu0 %v1932_v50  ;;  %v522_v50 = vld [vmem:[%s2825_s1 + $0x80] sm:$0xff]  ;;  %v527_v52 = vld [vmem:[%s2825_s1 + $0xa8] sm:$0xff] }
  0xdd   :  { %v1962_v55 = vpack.c.bf16 %v501_v54, %v500_v53  ;;  %v329_v56 = vpop.permute.xlu0 %328  ;;  %v520_v53 = vld [vmem:[%s2825_s1 + $0x70] sm:$0xff]  ;;  %v526_v54 = vld [vmem:[%s2825_s1 + $0xa0] sm:$0xff] }
  0xde   :  { %v334_v57 = vpop.permute.xlu1 %333  ;;  %v484_v58 = vmul.f32 %v2398_v5, %v329_v56  ;;  %v531_v56 = vld [vmem:[%s2825_s1 + $0xc8] sm:$0xff] }
  0xdf   :  { %v485_v59 = vmul.f32 %v2398_v5, %v334_v57  ;;  %1963 = vmatprep.subr.bf16.mxu1 %v1962_v55  ;;  %v525_v55 = vld [vmem:[%s2825_s1 + $0x98] sm:$0xff]  ;;  %v524_v57 = vld [vmem:[%s2825_s1 + $0x90] sm:$0xff] }
  0xe1   :  { %v1964_v60 = vpack.c.bf16 %v485_v59, %v484_v58  ;;  %v259_v61 = vpop.permute.xlu0 %258  ;;  %v530_v58 = vld [vmem:[%s2825_s1 + $0xc0] sm:$0xff]  ;;  %v529_v59 = vld [vmem:[%s2825_s1 + $0xb8] sm:$0xff] }
  0xe2   :  { %v264_v62 = vpop.permute.xlu1 %263  ;;  %v470_v63 = vmul.f32 %v2398_v5, %v259_v61  ;;  %v528_v61 = vld [vmem:[%s2825_s1 + $0xb0] sm:$0xff] }
  0xe3   :  { %v471_v0 = vmul.f32 %v2398_v5, %v264_v62  ;;  %1965 = vmatpush3.bf16.msra.mxu1 %v1964_v60  ;;  %v535_v60 = vld [vmem:[%s2825_s1 + $0xe8] sm:$0xff]  ;;  %v534_v62 = vld [vmem:[%s2825_s1 + $0xe0] sm:$0xff] }
  0xe5   :  { %v1934_v1 = vpack.c.bf16 %v471_v0, %v470_v63  ;;  %v179_v2 = vpop.permute.xlu0 %178  ;;  %v533_v63 = vld [vmem:[%s2825_s1 + $0xd8] sm:$0xff]  ;;  %v539_v0 = vld [vmem:[%s2825_s1 + $0x108] sm:$0xff] }
  0xe6   :  { %v184_v3 = vpop.permute.xlu1 %183  ;;  %v454_v4 = vmul.f32 %v2398_v5, %v179_v2  ;;  %v538_v2 = vld [vmem:[%s2825_s1 + $0x100] sm:$0xff] }
  0xe7   :  { %v455_v6 = vmul.f32 %v2398_v5, %v184_v3  ;;  %1935 = vmatprep.subr.bf16.mxu0 %v1934_v1  ;;  %v532_v1 = vld [vmem:[%s2825_s1 + $0xd0] sm:$0xff]  ;;  %v537_v3 = vld [vmem:[%s2825_s1 + $0xf8] sm:$0xff] }
  0xe9   :  { %v1936_v7 = vpack.c.bf16 %v455_v6, %v454_v4  ;;  %v419_v8 = vpop.permute.xlu0 %418  ;;  %v543_v4 = vld [vmem:[%s2825_s1 + $0x128] sm:$0xff]  ;;  %v536_v6 = vld [vmem:[%s2825_s1 + $0xf0] sm:$0xff] }
  0xea   :  { %v424_v9 = vpop.permute.xlu1 %423  ;;  %v502_v10 = vmul.f32 %v2398_v5, %v419_v8  ;;  %v541_v8 = vld [vmem:[%s2825_s1 + $0x118] sm:$0xff] }
  0xeb   :  { %v503_v11 = vmul.f32 %v2398_v5, %v424_v9  ;;  %1937 = vmatpush3.bf16.msra.mxu0 %v1936_v7  ;;  %v542_v7 = vld [vmem:[%s2825_s1 + $0x120] sm:$0xff]  ;;  %v547_v9 = vld [vmem:[%s2825_s1 + $0x148] sm:$0xff] }
  0xed   :  { %v1966_v12 = vpack.c.bf16 %v503_v11, %v502_v10  ;;  %v339_v13 = vpop.permute.xlu0 %338  ;;  %v540_v10 = vld [vmem:[%s2825_s1 + $0x110] sm:$0xff]  ;;  %v546_v11 = vld [vmem:[%s2825_s1 + $0x140] sm:$0xff] }
  0xee   :  { %v344_v14 = vpop.permute.xlu1 %343  ;;  %v486_v15 = vmul.f32 %v2398_v5, %v339_v13  ;;  %v551_v13 = vld [vmem:[%s2825_s1 + $0x168] sm:$0xff] }
  0xef   :  { %v487_v16 = vmul.f32 %v2398_v5, %v344_v14  ;;  %1967 = vmatprep.subr.bf16.mxu1 %v1966_v12  ;;  %v545_v12 = vld [vmem:[%s2825_s1 + $0x138] sm:$0xff]  ;;  %v544_v14 = vld [vmem:[%s2825_s1 + $0x130] sm:$0xff] }
  0xf1   :  { %v1968_v17 = vpack.c.bf16 %v487_v16, %v486_v15  ;;  %v269_v18 = vpop.permute.xlu0 %268  ;;  %v550_v15 = vld [vmem:[%s2825_s1 + $0x160] sm:$0xff]  ;;  %v549_v16 = vld [vmem:[%s2825_s1 + $0x158] sm:$0xff] }
  0xf2   :  { %v274_v19 = vpop.permute.xlu1 %273  ;;  %v472_v20 = vmul.f32 %v2398_v5, %v269_v18  ;;  %v548_v18 = vld [vmem:[%s2825_s1 + $0x150] sm:$0xff] }
  0xf3   :  { %v473_v21 = vmul.f32 %v2398_v5, %v274_v19  ;;  %1969 = vmatpush3.bf16.msra.mxu1 %v1968_v17  ;;  %v555_v17 = vld [vmem:[%s2825_s1 + $0x188] sm:$0xff]  ;;  %v554_v19 = vld [vmem:[%s2825_s1 + $0x180] sm:$0xff] }
  0xf5   :  { %v1938_v22 = vpack.c.bf16 %v473_v21, %v472_v20  ;;  %v189_v23 = vpop.permute.xlu0 %188  ;;  %v553_v20 = vld [vmem:[%s2825_s1 + $0x178] sm:$0xff]  ;;  %v559_v21 = vld [vmem:[%s2825_s1 + $0x1a8] sm:$0xff] }
  0xf6   :  { %v194_v24 = vpop.permute.xlu1 %193  ;;  %v456_v25 = vmul.f32 %v2398_v5, %v189_v23  ;;  %v558_v23 = vld [vmem:[%s2825_s1 + $0x1a0] sm:$0xff] }
  0xf7   :  { %v457_v26 = vmul.f32 %v2398_v5, %v194_v24  ;;  %1939 = vmatprep.subr.bf16.mxu0 %v1938_v22  ;;  %v552_v22 = vld [vmem:[%s2825_s1 + $0x170] sm:$0xff]  ;;  %v557_v24 = vld [vmem:[%s2825_s1 + $0x198] sm:$0xff] }
  0xf9   :  { %v1940_v27 = vpack.c.bf16 %v457_v26, %v456_v25  ;;  %v429_v28 = vpop.permute.xlu0 %428  ;;  %v563_v25 = vld [vmem:[%s2825_s1 + $0x1c8] sm:$0xff]  ;;  %v556_v26 = vld [vmem:[%s2825_s1 + $0x190] sm:$0xff] }
  0xfa   :  { %v434_v29 = vpop.permute.xlu1 %433  ;;  %v504_v30 = vmul.f32 %v2398_v5, %v429_v28  ;;  %v561_v28 = vld [vmem:[%s2825_s1 + $0x1b8] sm:$0xff] }
  0xfb   :  { %v505_v31 = vmul.f32 %v2398_v5, %v434_v29  ;;  %1941 = vmatpush3.bf16.msra.mxu0 %v1940_v27  ;;  %v562_v27 = vld [vmem:[%s2825_s1 + $0x1c0] sm:$0xff]  ;;  %v567_v29 = vld [vmem:[%s2825_s1 + $0x1e8] sm:$0xff] }
  0xfd   :  { %v1970_v34 = vpack.c.bf16 %v505_v31, %v504_v30  ;;  %v349_v35 = vpop.permute.xlu0 %348  ;;  %v560_v30 = vld [vmem:[%s2825_s1 + $0x1b0] sm:$0xff]  ;;  %v566_v31 = vld [vmem:[%s2825_s1 + $0x1e0] sm:$0xff] }
  0xfe   :  { %v354_v36 = vpop.permute.xlu1 %353  ;;  %642 = vmatmul.mubr.f32.vlgmr.msra.gmra.mrb[0].mxu0 %v506_v32  ;;  %v488_v37 = vmul.f32 %v2398_v5, %v349_v35  ;;  %v565_v32 = vld [vmem:[%s2825_s1 + $0x1d8] sm:$0xff]  ;;  %v568_v35 = vld [vmem:[%s2825_s1 + $0x1f0] sm:$0xff] }
  0xff   :  { %v489_v38 = vmul.f32 %v2398_v5, %v354_v36  ;;  %1971 = vmatprep.subr.bf16.mxu1 %v1970_v34  ;;  %646 = vmatprep.mubr.f32.mxu0 %v511_v33  ;;  %v514_v5 = vld [vmem:[%s2825_s1 + $0x40] sm:$0xff]  ;;  %v564_v33 = vld [vmem:[%s2825_s1 + $0x1d0] sm:$0xff]  ;;  %v569_v34 = vld [vmem:[%s2825_s1 + $0x1f8] sm:$0xff] }
 0x100   :  { %v867_v36 = vld [vmem:[%s2828_s4] sm:$0xff] }
 0x101   :  { %v1972_v41 = vpack.c.bf16 %v489_v38, %v488_v37 }
 0x102   :  { %647 = vmatmul.mubr.f32.gmra.mrb[2].mxu0 %v510_v39 }
 0x103   :  { %1973 = vmatpush3.bf16.msra.mxu1 %v1972_v41  ;;  %651 = vmatprep.mubr.f32.mxu0 %v515_v40  ;;  %v2656_v41 = vld [vmem:[%s2827_s3] ss:$0 sm:$0xff] }
 0x106   :  { %787 = vmatmul.mubr.f32.vlgmr.msra.gmra.mrb[0].mxu1 %v508_v42  ;;  %652 = vmatmul.mubr.f32.gmra.mrb[4].mxu0 %v514_v5 }
 0x107   :  { %791 = vmatprep.mubr.f32.mxu1 %v513_v43  ;;  %656 = vmatprep.mubr.f32.mxu0 %v519_v44 }
 0x10a   :  { %792 = vmatmul.mubr.f32.gmra.mrb[2].mxu1 %v512_v45  ;;  %657 = vmatmul.mubr.f32.gmra.mrb[6].mxu0 %v518_v46 }
 0x10b   :  { %796 = vmatprep.mubr.f32.mxu1 %v517_v47  ;;  %661 = vmatprep.mubr.f32.mxu0 %v523_v48 }
 0x10e   :  { %797 = vmatmul.mubr.f32.gmra.mrb[4].mxu1 %v516_v49  ;;  %662 = vmatmul.mubr.f32.gmra.mrb[8].mxu0 %v522_v50 }
 0x10f   :  { %801 = vmatprep.mubr.f32.mxu1 %v521_v51  ;;  %666 = vmatprep.mubr.f32.mxu0 %v527_v52 }
 0x112   :  { %802 = vmatmul.mubr.f32.gmra.mrb[6].mxu1 %v520_v53  ;;  %667 = vmatmul.mubr.f32.gmra.mrb[10].mxu0 %v526_v54 }
 0x113   :  { %806 = vmatprep.mubr.f32.mxu1 %v525_v55  ;;  %671 = vmatprep.mubr.f32.mxu0 %v531_v56 }
 0x116   :  { %807 = vmatmul.mubr.f32.gmra.mrb[8].mxu1 %v524_v57  ;;  %672 = vmatmul.mubr.f32.gmra.mrb[12].mxu0 %v530_v58 }
 0x117   :  { %811 = vmatprep.mubr.f32.mxu1 %v529_v59  ;;  %676 = vmatprep.mubr.f32.mxu0 %v535_v60 }
 0x11a   :  { %812 = vmatmul.mubr.f32.gmra.mrb[10].mxu1 %v528_v61  ;;  %677 = vmatmul.mubr.f32.gmra.mrb[14].mxu0 %v534_v62 }
 0x11b   :  { %816 = vmatprep.mubr.f32.mxu1 %v533_v63  ;;  %681 = vmatprep.mubr.f32.mxu0 %v539_v0 }
 0x11e   :  { %817 = vmatmul.mubr.f32.gmra.mrb[12].mxu1 %v532_v1  ;;  %682 = vmatmul.mubr.f32.gmra.mrb[16].mxu0 %v538_v2 }
 0x11f   :  { %821 = vmatprep.mubr.f32.mxu1 %v537_v3  ;;  %686 = vmatprep.mubr.f32.mxu0 %v543_v4 }
 0x122   :  { %822 = vmatmul.mubr.f32.gmra.mrb[14].mxu1 %v536_v6  ;;  %687 = vmatmul.mubr.f32.gmra.mrb[18].mxu0 %v542_v7 }
 0x123   :  { %826 = vmatprep.mubr.f32.mxu1 %v541_v8  ;;  %691 = vmatprep.mubr.f32.mxu0 %v547_v9 }
 0x126   :  { %827 = vmatmul.mubr.f32.gmra.mrb[16].mxu1 %v540_v10  ;;  %692 = vmatmul.mubr.f32.gmra.mrb[20].mxu0 %v546_v11 }
 0x127   :  { %831 = vmatprep.mubr.f32.mxu1 %v545_v12  ;;  %696 = vmatprep.mubr.f32.mxu0 %v551_v13 }
 0x12a   :  { %832 = vmatmul.mubr.f32.gmra.mrb[18].mxu1 %v544_v14  ;;  %697 = vmatmul.mubr.f32.gmra.mrb[22].mxu0 %v550_v15 }
 0x12b   :  { %836 = vmatprep.mubr.f32.mxu1 %v549_v16  ;;  %701 = vmatprep.mubr.f32.mxu0 %v555_v17 }
 0x12e   :  { %837 = vmatmul.mubr.f32.gmra.mrb[20].mxu1 %v548_v18  ;;  %702 = vmatmul.mubr.f32.gmra.mrb[24].mxu0 %v554_v19 }
 0x12f   :  { %841 = vmatprep.mubr.f32.mxu1 %v553_v20  ;;  %706 = vmatprep.mubr.f32.mxu0 %v559_v21 }
 0x132   :  { %842 = vmatmul.mubr.f32.gmra.mrb[22].mxu1 %v552_v22  ;;  %707 = vmatmul.mubr.f32.gmra.mrb[26].mxu0 %v558_v23 }
 0x133   :  { %846 = vmatprep.mubr.f32.mxu1 %v557_v24  ;;  %711 = vmatprep.mubr.f32.mxu0 %v563_v25 }
 0x136   :  { %847 = vmatmul.mubr.f32.gmra.mrb[24].mxu1 %v556_v26  ;;  %712 = vmatmul.mubr.f32.gmra.mrb[28].mxu0 %v562_v27 }
 0x137   :  { %851 = vmatprep.mubr.f32.mxu1 %v561_v28  ;;  %716 = vmatprep.mubr.f32.mxu0 %v567_v29 }
 0x13a   :  { %852 = vmatmul.mubr.f32.gmra.mrb[26].mxu1 %v560_v30  ;;  %717 = vmatmul.mubr.f32.gmra.mrb[30].mxu0 %v566_v31 }
 0x13b   :  { %856 = vmatprep.mubr.f32.mxu1 %v565_v32 }
 0x13e   :  { %857 = vmatmul.mubr.f32.gmra.mrb[28].mxu1 %v564_v33 }
 0x13f   :  { %861 = vmatprep.mubr.f32.mxu1 %v569_v34 }
 0x142   :  { %862 = vmatmul.mubr.f32.gmra.mrb[30].mxu1 %v568_v35 }
 0x143   :  { %1805 = vmatprep.mubr.f32.mxu1 %v867_v36 }
 0x1d1   :  { %v1573_v37 = vpop.f32.mrb[0].mxu0 }
 0x1d2   :  { %v1574_v38 = vpop.f32.mrb[1].mxu0 }
 0x1d3   :  { %v1575_v39 = vadd.f32 %v1574_v38, %v1573_v37 }
 0x1d5   :  { %v1576_v40 = vpop.f32.mrb[2].mxu0  ;;  %v644_v43 = vadd.f32 %v1575_v39, %v2656_v41 }
 0x1d6   :  { %v1577_v42 = vpop.f32.mrb[3].mxu0 }
 0x1d7   :  { %v1578_v5 = vadd.f32 %v1577_v42, %v1576_v40 }
 0x1d9   :  { %v1653_v44 = vpop.f32.mrb[0].mxu1  ;;  %v1579_v45 = vpop.f32.mrb[4].mxu0  ;;  %v649_v51 = vadd.f32 %v1578_v5, %v2656_v41 }
 0x1da   :  { %v1654_v46 = vpop.f32.mrb[1].mxu1  ;;  %v1580_v47 = vpop.f32.mrb[5].mxu0 }
 0x1db   :  { %v1655_v48 = vadd.f32 %v1654_v46, %v1653_v44  ;;  %v1581_v49 = vadd.f32 %v1580_v47, %v1579_v45 }
 0x1dd   :  { %v789_v50 = vadd.f32 %v1655_v48, %v644_v43  ;;  %v1656_v52 = vpop.f32.mrb[2].mxu1  ;;  %v1582_v53 = vpop.f32.mrb[6].mxu0  ;;  %v654_v59 = vadd.f32 %v1581_v49, %v2656_v41 }
 0x1de   :  { %v1657_v54 = vpop.f32.mrb[3].mxu1  ;;  %v1583_v55 = vpop.f32.mrb[7].mxu0 }
 0x1df   :  { %v1658_v56 = vadd.f32 %v1657_v54, %v1656_v52  ;;  %v1584_v57 = vadd.f32 %v1583_v55, %v1582_v53 }
 0x1e1   :  { %v794_v58 = vadd.f32 %v1658_v56, %v649_v51  ;;  %v1659_v60 = vpop.f32.mrb[4].mxu1  ;;  %v1585_v61 = vpop.f32.mrb[8].mxu0  ;;  %v659_v4 = vadd.f32 %v1584_v57, %v2656_v41 }
 0x1e2   :  { %v1660_v62 = vpop.f32.mrb[5].mxu1  ;;  %v1586_v63 = vpop.f32.mrb[9].mxu0 }
 0x1e3   :  { %v1661_v0 = vadd.f32 %v1660_v62, %v1659_v60  ;;  %v1974_v1 = vpack.c.bf16 %v794_v58, %v789_v50  ;;  %v1587_v2 = vadd.f32 %v1586_v63, %v1585_v61 }
 0x1e5   :  { %v799_v3 = vadd.f32 %v1661_v0, %v654_v59  ;;  %v1662_v6 = vpop.f32.mrb[6].mxu1  ;;  %1975 = vmatprep.subr.bf16.mxu1 %v1974_v1  ;;  %v1588_v7 = vpop.f32.mrb[10].mxu0  ;;  %v664_v13 = vadd.f32 %v1587_v2, %v2656_v41 }
 0x1e6   :  { %v1663_v8 = vpop.f32.mrb[7].mxu1  ;;  %1977 = vmatpush3.bf16.msra.mxu1 %v1974_v1  ;;  %v1589_v9 = vpop.f32.mrb[11].mxu0 }
 0x1e7   :  { %v1664_v10 = vadd.f32 %v1663_v8, %v1662_v6  ;;  %v1590_v11 = vadd.f32 %v1589_v9, %v1588_v7 }
 0x1e9   :  { %v804_v12 = vadd.f32 %v1664_v10, %v659_v4  ;;  %v1665_v14 = vpop.f32.mrb[8].mxu1  ;;  %v1591_v15 = vpop.f32.mrb[12].mxu0  ;;  %v669_v22 = vadd.f32 %v1590_v11, %v2656_v41 }
 0x1ea   :  { %v1666_v16 = vpop.f32.mrb[9].mxu1  ;;  %v1592_v17 = vpop.f32.mrb[13].mxu0 }
 0x1eb   :  { %v1667_v18 = vadd.f32 %v1666_v16, %v1665_v14  ;;  %v1978_v19 = vpack.c.bf16 %v804_v12, %v799_v3  ;;  %v1593_v20 = vadd.f32 %v1592_v17, %v1591_v15 }
 0x1ed   :  { %v809_v21 = vadd.f32 %v1667_v18, %v664_v13  ;;  %v1668_v23 = vpop.f32.mrb[10].mxu1  ;;  %1979 = vmatprep.subr.bf16.mxu1 %v1978_v19  ;;  %v1594_v24 = vpop.f32.mrb[14].mxu0  ;;  %v674_v30 = vadd.f32 %v1593_v20, %v2656_v41 }
 0x1ee   :  { %v1669_v25 = vpop.f32.mrb[11].mxu1  ;;  %1981 = vmatpush3.bf16.msra.mxu1 %v1978_v19  ;;  %v1595_v26 = vpop.f32.mrb[15].mxu0 }
 0x1ef   :  { %v1670_v27 = vadd.f32 %v1669_v25, %v1668_v23  ;;  %v1596_v28 = vadd.f32 %v1595_v26, %v1594_v24 }
 0x1f1   :  { %v814_v29 = vadd.f32 %v1670_v27, %v669_v22  ;;  %v1671_v31 = vpop.f32.mrb[12].mxu1  ;;  %v1597_v32 = vpop.f32.mrb[16].mxu0  ;;  %v679_v39 = vadd.f32 %v1596_v28, %v2656_v41 }
 0x1f2   :  { %v1672_v33 = vpop.f32.mrb[13].mxu1  ;;  %v1598_v34 = vpop.f32.mrb[17].mxu0 }
 0x1f3   :  { %v1673_v35 = vadd.f32 %v1672_v33, %v1671_v31  ;;  %v1982_v36 = vpack.c.bf16 %v814_v29, %v809_v21  ;;  %v1599_v37 = vadd.f32 %v1598_v34, %v1597_v32 }
 0x1f5   :  { %v819_v38 = vadd.f32 %v1673_v35, %v674_v30  ;;  %v1674_v40 = vpop.f32.mrb[14].mxu1  ;;  %1983 = vmatprep.subr.bf16.mxu1 %v1982_v36  ;;  %v1600_v42 = vpop.f32.mrb[18].mxu0  ;;  %v684_v47 = vadd.f32 %v1599_v37, %v2656_v41 }
 0x1f6   :  { %v1675_v5 = vpop.f32.mrb[15].mxu1  ;;  %1985 = vmatpush3.bf16.msra.mxu1 %v1982_v36  ;;  %v1601_v43 = vpop.f32.mrb[19].mxu0 }
 0x1f7   :  { %v1676_v44 = vadd.f32 %v1675_v5, %v1674_v40  ;;  %v1602_v45 = vadd.f32 %v1601_v43, %v1600_v42 }
 0x1f9   :  { %v824_v46 = vadd.f32 %v1676_v44, %v679_v39  ;;  %v1677_v48 = vpop.f32.mrb[16].mxu1  ;;  %v1603_v49 = vpop.f32.mrb[20].mxu0  ;;  %v689_v56 = vadd.f32 %v1602_v45, %v2656_v41  ;;  %v956_v45 = vld [vmem:[%s2829_s5] sm:$0xff] }
 0x1fa   :  { %v1678_v50 = vpop.f32.mrb[17].mxu1  ;;  %v1604_v51 = vpop.f32.mrb[21].mxu0 }
 0x1fb   :  { %v1679_v52 = vadd.f32 %v1678_v50, %v1677_v48  ;;  %v1986_v53 = vpack.c.bf16 %v824_v46, %v819_v38  ;;  %v1605_v54 = vadd.f32 %v1604_v51, %v1603_v49  ;;  %v957_v46 = vld [vmem:[%s2829_s5 + $0x8] sm:$0xff]  ;;  %v959_v50 = vld [vmem:[%s2829_s5 + $0x18] sm:$0xff] }
 0x1fc   :  { %v2006_v49 = vpack.c.bf16 %v957_v46, %v956_v45  ;;  %v868_v51 = vld [vmem:[%s2828_s4 + $0x8] sm:$0xff]  ;;  %v1260_v45 = vld [vmem:[%s2834_s10 + $0x78] sm:$0xff] }
 0x1fd   :  { %v829_v55 = vadd.f32 %v1679_v52, %v684_v47  ;;  %v1680_v57 = vpop.f32.mrb[18].mxu1  ;;  %1987 = vmatprep.subr.bf16.mxu1 %v1986_v53  ;;  %v1606_v58 = vpop.f32.mrb[22].mxu0  ;;  %v694_v0 = vadd.f32 %v1605_v54, %v2656_v41  ;;  %v869_v52 = vld [vmem:[%s2828_s4 + $0x10] sm:$0xff]  ;;  %v870_v54 = vld [vmem:[%s2828_s4 + $0x18] sm:$0xff] }
 0x1fe   :  { %v1681_v59 = vpop.f32.mrb[19].mxu1  ;;  %1989 = vmatpush3.bf16.msra.mxu1 %v1986_v53  ;;  %v1607_v60 = vpop.f32.mrb[23].mxu0 }
 0x1ff   :  { %v1682_v61 = vadd.f32 %v1681_v59, %v1680_v57  ;;  %v1608_v62 = vadd.f32 %v1607_v60, %v1606_v58  ;;  %v1065_v59 = vld [vmem:[%s2831_s7] sm:$0xff] }
 0x200   :  { %1833 = vmatprep.mubr.msk.f32.mxu0 %vm967_vm0, %v1065_v59  ;;  %v1148_v60 = vld [vmem:[%s2832_s8] sm:$0xff] }
 0x201   :  { %v834_v63 = vadd.f32 %v1682_v61, %v689_v56  ;;  %v1683_v1 = vpop.f32.mrb[20].mxu1  ;;  %v1609_v2 = vpop.f32.mrb[24].mxu0  ;;  %v699_v10 = vadd.f32 %v1608_v62, %v2656_v41  ;;  %v1149_v61 = vld [vmem:[%s2832_s8 + $0x8] sm:$0xff]  ;;  %v1150_v62 = vld [vmem:[%s2832_s8 + $0x10] sm:$0xff] }
 0x202   :  { %v1684_v3 = vpop.f32.mrb[21].mxu1  ;;  %v1610_v4 = vpop.f32.mrb[25].mxu0 }
 0x203   :  { %v1685_v6 = vadd.f32 %v1684_v3, %v1683_v1  ;;  %v1990_v7 = vpack.c.bf16 %v834_v63, %v829_v55  ;;  %v1611_v8 = vadd.f32 %v1610_v4, %v1609_v2  ;;  %v2022_v63 = vpack.c.bf16 %v1149_v61, %v1148_v60  ;;  %v1152_v2 = vld [vmem:[%s2832_s8 + $0x20] sm:$0xff]  ;;  %v1153_v3 = vld [vmem:[%s2832_s8 + $0x28] sm:$0xff] }
 0x204   :  { %v2030_v4 = vpack.c.bf16 %v1153_v3, %v1152_v2  ;;  %v1337_v60 = vld [vmem:[%s2835_s11 + $0x8] sm:$0xff] }
 0x205   :  { %v839_v9 = vadd.f32 %v1685_v6, %v694_v0  ;;  %v1686_v11 = vpop.f32.mrb[22].mxu1  ;;  %1991 = vmatprep.subr.bf16.mxu1 %v1990_v7  ;;  %v1612_v12 = vpop.f32.mrb[26].mxu0  ;;  %v704_v18 = vadd.f32 %v1611_v8, %v2656_v41  ;;  %v1151_v0 = vld [vmem:[%s2832_s8 + $0x18] sm:$0xff]  ;;  %v1154_v6 = vld [vmem:[%s2832_s8 + $0x30] sm:$0xff] }
 0x206   :  { %v1687_v13 = vpop.f32.mrb[23].mxu1  ;;  %1993 = vmatpush3.bf16.msra.mxu1 %v1990_v7  ;;  %v1613_v14 = vpop.f32.mrb[27].mxu0  ;;  %v2026_v1 = vpack.c.bf16 %v1151_v0, %v1150_v62  ;;  %v1155_v7 = vld [vmem:[%s2832_s8 + $0x38] sm:$0xff]  ;;  %v2113_v0 = vmov 0.0|0.0  }
 0x207   :  { %v1688_v15 = vadd.f32 %v1687_v13, %v1686_v11  ;;  %v1614_v16 = vadd.f32 %v1613_v14, %v1612_v12  ;;  %v2034_v8 = vpack.c.bf16 %v1155_v7, %v1154_v6  ;;  %v1427_v6 = vld [vmem:[%s2836_s12] sm:$0x3] }
 0x208   :  { %v1539_v7 = vld [vmem:[%s2838_s14] ss:$0 sm:$0xff] }
 0x209   :  { %v844_v17 = vadd.f32 %v1688_v15, %v699_v10  ;;  %v1689_v19 = vpop.f32.mrb[24].mxu1  ;;  %v1615_v20 = vpop.f32.mrb[28].mxu0  ;;  %v709_v27 = vadd.f32 %v1614_v16, %v2656_v41 }
 0x20a   :  { %v1690_v21 = vpop.f32.mrb[25].mxu1  ;;  %v1616_v22 = vpop.f32.mrb[29].mxu0 }
 0x20b   :  { %v1691_v23 = vadd.f32 %v1690_v21, %v1689_v19  ;;  %v1994_v24 = vpack.c.bf16 %v844_v17, %v839_v9  ;;  %v1617_v25 = vadd.f32 %v1616_v22, %v1615_v20  ;;  %v1527_v9 = vld [vmem:[%s2830_s6] ss:$0 sm:$0xff]  ;;  %v1066_v20 = vld [vmem:[%s2831_s7 + $0x8] sm:$0xff]  ;;  %s2116_s6 = smov [#allocation2]  }
 0x20c   :  { %v1245_v21 = vld [vmem:[%s2834_s10] sm:$0xff]  ;;  %v1246_v22 = vld [vmem:[%s2834_s10 + $0x8] sm:$0xff] }
 0x20d   :  { %v849_v26 = vadd.f32 %v1691_v23, %v704_v18  ;;  %v1692_v28 = vpop.f32.mrb[26].mxu1  ;;  %1995 = vmatprep.subr.bf16.mxu1 %v1994_v24  ;;  %v1618_v29 = vpop.f32.mrb[30].mxu0  ;;  %v714_v35 = vadd.f32 %v1617_v25, %v2656_v41  ;;  %v1247_v23 = vld [vmem:[%s2834_s10 + $0x10] sm:$0xff]  ;;  %v1248_v25 = vld [vmem:[%s2834_s10 + $0x18] sm:$0xff] }
 0x20e   :  { %v1693_v30 = vpop.f32.mrb[27].mxu1  ;;  %1997 = vmatpush3.bf16.msra.mxu1 %v1994_v24  ;;  %v1619_v31 = vpop.f32.mrb[31].mxu0  ;;  %v2038_v24 = vpack.c.bf16 %v1246_v22, %v1245_v21 }
 0x20f   :  { %v1694_v32 = vadd.f32 %v1693_v30, %v1692_v28  ;;  %v1620_v33 = vadd.f32 %v1619_v31, %v1618_v29  ;;  %v1250_v28 = vld [vmem:[%s2834_s10 + $0x28] sm:$0xff]  ;;  %v1251_v30 = vld [vmem:[%s2834_s10 + $0x30] sm:$0xff]  ;;  %v1252_v31 = vld [vmem:[%s2834_s10 + $0x38] sm:$0xff] }
 0x211   :  { %v854_v34 = vadd.f32 %v1694_v32, %v709_v27  ;;  %v1695_v36 = vpop.f32.mrb[28].mxu1  ;;  %v719_v42 = vadd.f32 %v1620_v33, %v2656_v41  ;;  %v958_v41 = vld [vmem:[%s2829_s5 + $0x10] sm:$0xff]  ;;  %v1249_v27 = vld [vmem:[%s2834_s10 + $0x20] sm:$0xff]  ;;  %v2050_v32 = vpack.c.bf16 %v1252_v31, %v1251_v30  ;;  %s1517_s5 = sshll.u32 %s2116_s6, 4  ;;  %s1518_s5 = int_to_ptr.vmem [resolvable:$true] %s1517_s5 }
 0x212   :  { %v1696_v37 = vpop.f32.mrb[29].mxu1  ;;  %v2010_v53 = vpack.c.bf16 %v959_v50, %v958_v41  ;;  %v2046_v29 = vpack.c.bf16 %v1250_v28, %v1249_v27  ;;  %v1253_v33 = vld [vmem:[%s2834_s10 + $0x40] sm:$0xff]  ;;  %v1343_v50 = vld [vmem:[%s2837_s13 + $0x18] sm:$0xff]  ;;  %s2088_s19 = scalar_lea.vmem %s1518_s5, 32  ;;  %p2093_p1 = scmp.lt.s32.totalorder %s1518_s5, %s1518_s5 }
 0x213   :  { %v1697_v38 = vadd.f32 %v1696_v37, %v1695_v36  ;;  %v1998_v39 = vpack.c.bf16 %v854_v34, %v849_v26  ;;  %v2042_v26 = vpack.c.bf16 %v1248_v25, %v1247_v23  ;;  %v1254_v34 = vld [vmem:[%s2834_s10 + $0x48] sm:$0xff]  ;;  %v1255_v36 = vld [vmem:[%s2834_s10 + $0x50] sm:$0xff]  ;;  %v1256_v37 = vld [vmem:[%s2834_s10 + $0x58] sm:$0xff]  ;;  %p2089_p0 = scmp.ne.s32.totalorder %s1518_s5, %s2088_s19  ;;  %p2094_p2 = scmp.lt.s32.totalorder %s2088_s19, %s2088_s19 }
 0x215   :  { %v859_v40 = vadd.f32 %v1697_v38, %v714_v35  ;;  %v1698_v5 = vpop.f32.mrb[30].mxu1  ;;  %1999 = vmatprep.subr.bf16.mxu1 %v1998_v39  ;;  %v2054_v35 = vpack.c.bf16 %v1254_v34, %v1253_v33  ;;  %v2058_v38 = vpack.c.bf16 %v1256_v37, %v1255_v36  ;;  %p2095_p3 = por %p2094_p2, %p2093_p1 }
 0x216   :  { %v1699_v43 = vpop.f32.mrb[31].mxu1  ;;  %2001 = vmatpush3.bf16.msra.mxu1 %v1998_v39  ;;  %v1257_v39 = vld [vmem:[%s2834_s10 + $0x60] sm:$0xff] }
 0x217   :  { %v1700_v44 = vadd.f32 %v1699_v43, %v1698_v5  ;;  %p2096_p4 = pnand %p2095_p3, %p2089_p0 }
 0x219   :  { %v864_v47 = vadd.f32 %v1700_v44, %v719_v42  ;;  %v1259_v44 = vld [vmem:[%s2834_s10 + $0x70] sm:$0xff] }
 0x21a   :  { %v2066_v46 = vpack.c.bf16 %v1260_v45, %v1259_v44 }
 0x21b   :  { %v2002_v48 = vpack.c.bf16 %v864_v47, %v859_v40  ;;  %v1258_v40 = vld [vmem:[%s2834_s10 + $0x68] sm:$0xff]  ;;  %v1340_v47 = vld [vmem:[%s2837_s13] sm:$0xff] }
 0x21c   :  { %v2062_v42 = vpack.c.bf16 %v1258_v40, %v1257_v39 }
 0x21d   :  { %2003 = vmatprep.subr.bf16.mxu1 %v2002_v48 }
 0x21e   :  { %2005 = vmatpush3.bf16.msra.mxu1 %v2002_v48  ;;  %v1341_v48 = vld [vmem:[%s2837_s13 + $0x8] sm:$0xff] }
 0x21f   :  { %2007 = vmatprep.subr.bf16.mxu1 %v2006_v49  ;;  %v2070_v41 = vpack.c.bf16 %v1341_v48, %v1340_v47 }
 0x221   :  { %1806 = vmatmul.mubr.f32.vlgmr.msra.gmra.mrb[32].mxu1 %v868_v51 }
 0x222   :  { %1808 = vmatprep.mubr.f32.mxu1 %v869_v52  ;;  %2009 = vmatpush3.bf16.msra.mxu1 %v2006_v49  ;;  %v1342_v49 = vld [vmem:[%s2837_s13 + $0x10] sm:$0xff]  ;;  %v1534_v52 = vld [vmem:[%s2833_s9] ss:$0 sm:$0xff] }
 0x223   :  { %2011 = vmatprep.subr.bf16.mxu1 %v2010_v53  ;;  %v2074_v51 = vpack.c.bf16 %v1343_v50, %v1342_v49 }
 0x225   :  { %1809 = vmatmul.mubr.f32.gmra.mrb[34].mxu1 %v870_v54 }
 0x226   :  { %2013 = vmatpush3.bf16.msra.mxu1 %v2010_v53 }
 0x227   :  { %2023 = vmatprep.subr.bf16.mxu1 %v2022_v63 }
 0x2f4   :  { %v1807_v55 = vpop.f32.mrb[32].mxu1 }
 0x2f5   :  { %v937_v56 = vpop.f32.mrb[33].mxu1 }
 0x2f6   :  { %1819 = vmatprep.mubr.msk.f32.mxu1 %vm967_vm0, %v937_v56 }
 0x2f7   :  { %1820 = vmatmul.mubr.msk.f32.vlgmr.msra.gmra.mrb[36].mxu1 %vm967_vm0, %v1807_v55 }
 0x2f8   :  { %v1810_v57 = vpop.f32.mrb[34].mxu1  ;;  %2025 = vmatpush3.bf16.msra.mxu1 %v2022_v63 }
 0x2f9   :  { %v947_v58 = vpop.f32.mrb[35].mxu1  ;;  %2027 = vmatprep.subr.bf16.mxu1 %v2026_v1 }
 0x2fa   :  { %1822 = vmatprep.mubr.msk.f32.mxu1 %vm967_vm0, %v947_v58  ;;  %v1336_v58 = vld [vmem:[%s2835_s11] sm:$0xff] }
 0x2fb   :  { %1823 = vmatmul.mubr.msk.f32.gmra.mrb[38].mxu1 %vm967_vm0, %v1810_v57  ;;  %v1344_v57 = vld [vmem:[%s2837_s13 + $0x20] sm:$0xff] }
 0x2fc   :  { %2029 = vmatpush3.bf16.msra.mxu1 %v2026_v1  ;;  %v2115_v1 = vmov 0.0  }
 0x2fd   :  { %2031 = vmatprep.subr.bf16.mxu1 %v2030_v4 }
 0x300   :  { %2033 = vmatpush3.bf16.msra.mxu1 %v2030_v4 }
 0x301   :  { %2035 = vmatprep.subr.bf16.mxu1 %v2034_v8 }
 0x304   :  { %2037 = vmatpush3.bf16.msra.mxu1 %v2034_v8 }
 0x305   :  { %2071 = vmatprep.subr.bf16.mxu1 %v2070_v41 }
 0x3ca   :  { %v1821_v10 = vpop.f32.mrb[36].mxu1 }
 0x3cb   :  { %v1052_v11 = vadd.f32 %v1821_v10, %v1527_v9  ;;  %v1046_v12 = vpop.f32.mrb[37].mxu1 }
 0x3cc   :  { %v1047_v13 = vadd.f32 %v1527_v9, %v1046_v12 }
 0x3ce   :  { %v2014_v14 = vpack.c.bf16 %v1052_v11, %v1047_v13  ;;  %v1824_v15 = vpop.f32.mrb[38].mxu1 }
 0x3cf   :  { %v1062_v16 = vadd.f32 %v1824_v15, %v1527_v9  ;;  %v1056_v17 = vpop.f32.mrb[39].mxu1 }
 0x3d0   :  { %2015 = vmatprep.subr.bf16.mxu0 %v2014_v14  ;;  %v1057_v18 = vadd.f32 %v1527_v9, %v1056_v17 }
 0x3d1   :  { %2017 = vmatpush3.bf16.msra.mxu0 %v2014_v14 }
 0x3d2   :  { %v2018_v19 = vpack.c.bf16 %v1062_v16, %v1057_v18 }
 0x3d4   :  { %2019 = vmatprep.subr.bf16.mxu0 %v2018_v19 }
 0x3d5   :  { %2021 = vmatpush3.bf16.msra.mxu0 %v2018_v19 }
 0x3d6   :  { %2039 = vmatprep.subr.bf16.mxu0 %v2038_v24 }
 0x3d8   :  { %1834 = vmatmul.mubr.msk.f32.vlgmr.msra.gmra.mrb[32].mxu0 %vm967_vm0, %v1066_v20 }
 0x3d9   :  { %2041 = vmatpush3.bf16.msra.mxu0 %v2038_v24 }
 0x3da   :  { %2043 = vmatprep.subr.bf16.mxu0 %v2042_v26 }
 0x3dd   :  { %2045 = vmatpush3.bf16.msra.mxu0 %v2042_v26 }
 0x3de   :  { %2047 = vmatprep.subr.bf16.mxu0 %v2046_v29 }
 0x3e1   :  { %2049 = vmatpush3.bf16.msra.mxu0 %v2046_v29 }
 0x3e2   :  { %2051 = vmatprep.subr.bf16.mxu0 %v2050_v32 }
 0x3e5   :  { %2053 = vmatpush3.bf16.msra.mxu0 %v2050_v32 }
 0x3e6   :  { %2055 = vmatprep.subr.bf16.mxu0 %v2054_v35 }
 0x3e9   :  { %2057 = vmatpush3.bf16.msra.mxu0 %v2054_v35 }
 0x3ea   :  { %2059 = vmatprep.subr.bf16.mxu0 %v2058_v38 }
 0x3ed   :  { %2061 = vmatpush3.bf16.msra.mxu0 %v2058_v38 }
 0x3ee   :  { %2063 = vmatprep.subr.bf16.mxu0 %v2062_v42 }
 0x3f1   :  { %2065 = vmatpush3.bf16.msra.mxu0 %v2062_v42 }
 0x3f2   :  { %2067 = vmatprep.subr.bf16.mxu0 %v2066_v46 }
 0x3f5   :  { %2069 = vmatpush3.bf16.msra.mxu0 %v2066_v46 }
 0x3f6   :  { %2078 = vmatprep.subr.bf16.mxu0 %v2113_v0 }
 0x4ab   :  { %v1835_v5 = vpop.f32.mrb[32].mxu0 }
 0x4ac   :  { %v1139_v43 = vpop.f32.mrb[33].mxu0 }
 0x4ad   :  { %1852 = vmatprep.mubr.msk.f32.mxu1 %vm1163_vm1, %v1139_v43 }
 0x4ae   :  { %1853 = vmatmul.mubr.msk.f32.vlgmr.msra.gmra.mrb[40].mxu1 %vm1163_vm1, %v1835_v5 }
 0x4af   :  { %2073 = vmatpush3.bf16.msra.mxu1 %v2070_v41 }
 0x4b0   :  { %2075 = vmatprep.subr.bf16.mxu1 %v2074_v51 }
 0x4b3   :  { %2077 = vmatpush3.bf16.msra.mxu1 %v2074_v51 }
 0x4b4   :  { %1898 = vmatprep.subr.mxu1 %v1344_v57 }
 0x4b7   :  { %1899 = vmatpush3.msra.mxu1 %v1344_v57 }
 0x581   :  { %v1854_v53 = vpop.f32.mrb[40].mxu1 }
 0x582   :  { %v1236_v54 = vpop.f32.mrb[41].mxu1  ;;  %v1242_v56 = vadd.f32 %v1854_v53, %v1534_v52 }
 0x583   :  { %v1237_v55 = vadd.f32 %v1534_v52, %v1236_v54 }
 0x585   :  { %1887 = vmatprep.mubr.f32.mxu0 %v1237_v55 }
 0x586   :  { %1888 = vmatmul.mubr.f32.vlgmr.msra.gmra.mrb[34].mxu0 %v1242_v56 }
 0x587   :  { %1907 = vmatprep.mubr.msk.f32.mxu0 %vm2114_vm3, %v2115_v1 }
 0x659   :  { %v1889_v59 = vpop.f32.mrb[34].mxu0 }
 0x65a   :  { %v1327_v61 = vpop.f32.mrb[35].mxu0  ;;  %v1339_v63 = vmul.f32 %v1889_v59, %v1337_v60 }
 0x65b   :  { %v1338_v62 = vmul.f32 %v1336_v58, %v1327_v61 }
 0x65d   :  { %1900 = vmatprep.mubr.msk.f32.mxu1 %vm1345_vm2, %v1338_v62 }
 0x65e   :  { %1901 = vmatmul.mubr.msk.f32.vlgmr.msra.gmra.mrb[42].mxu1 %vm1345_vm2, %v1339_v63 }
 0x731   :  { %v1902_v2 = vpop.f32.mrb[42].mxu1 }
 0x732   :  { %v1418_v3 = vpop.f32.mrb[43].mxu1 }
 0x733   :  { %v2079_v4 = vpack.c.bf16 %v1902_v2, %v1418_v3 }
 0x735   :  { %2080 = vmatpush3.bf16.msra.mxu0 %v2079_v4 }
 0x738   :  { %1908 = vmatmul.mubr.msk.f32.vlgmr.msra.gmra.mrb[36].mxu0 %vm1435_vm4, %v1427_v6 }
 0x80b   :  { %v1505_v8 = vpop.f32.mrb[36].mxu0 }
 0x80c   :  { %v1506_v9 = vadd.f32 %v1539_v7, %v1505_v8  ;;  %v1909_v10 = vpop.f32.mrb[37].mxu0 }
 0x80e   :  { %1510 = vst.msk [vmem:[#allocation2] sm:$0x3] %vm1509_vm5, %v1506_v9 }
 0x80f   :  { %2099 = shalt.err (!%p2096_p4)
}
 0x810   :  { %s2100_s20 = scalar_lea.hbm %s2839_s15, 32 }
 0x811   :  { %p2101_p5 = scmp.ne.s32.totalorder %s2839_s15, %s2100_s20  ;;  %p2104_p6 = scmp.lt.u32.totalorder %s2100_s20, %s2839_s15 }
 0x813   :  { %p2106_p7 = pnand %p2104_p6, %p2101_p5 }
 0x815   :  { %2109 = shalt.err (!%p2106_p7)
}
 0x816   :  { %1520 = dma.vmem_to_hbm [thread:$0]  %s1518_s5, 32, %s2839_s15, [#allocation3]  }
 0x817   :  { %2110 = dma.done.wait [#allocation3], 32  }
 0x818   :  { %2111 = vsyncadd [#allocation3], 4294967264 }
 0x819   :  { %1524 = vsyncpa [#allocation3], 1 }

</bundles_post_ra>
